<compile_context>
chip_gen: v7x
topology: tpu7x:2x2x1
jax: 0.10.0
libtpu: 0.0.40
codegen_flags: <defaults>
</compile_context>

<pallas_src>
import jax
import jax.numpy as jnp
from jax.experimental import pallas as pl
from jax.experimental.pallas import tpu as pltpu

HIDDEN = 256  # fixed by the module (fc1 -> 256)


def _round_up(x: int, m: int) -> int:
    return (x + m - 1) // m * m


def _tiny_sdf_mlp_kernel(x_ref, w1_ref, b1_ref, w2_ref, b2_ref, o_ref):
    # x_ref:  (tm, in_dim)      compute dtype (f32 default, bf16 optional)
    # w1_ref: (in_dim, 256)     compute dtype
    # b1_ref: (1, 256)          f32
    # w2_ref: (256, out_dim)    compute dtype
    # b2_ref: (1, out_dim)      f32
    # o_ref:  (tm, out_dim)     output dtype
    #
    # fc1 on the MXU with f32 accumulation.
    h = jnp.dot(x_ref[...], w1_ref[...], preferred_element_type=jnp.float32)
    # Bias + ReLU in f32 on the VPU.
    h = jnp.maximum(h + b1_ref[...], 0.0)
    # Cast back to the matmul compute dtype only on the bf16 path (trace-time
    # branch; no-op / no buffer on the default f32 path).
    if h.dtype != w2_ref.dtype:
        h = h.astype(w2_ref.dtype)
    # sdf_linear.batch_forward == plain linear: (tm, 256) @ (256, out_dim).
    y = jnp.dot(h, w2_ref[...], preferred_element_type=jnp.float32)
    o_ref[...] = (y + b2_ref[...]).astype(o_ref.dtype)


def tiny_sdf_mlp(x, w1, b1, w2, b2, *, tm=4096,
                 compute_dtype=jnp.float32, out_dtype=None):
    """Fused forward pass of TinySDFMLP.

    Args:
      x:  (B, in_dim) activations.
      w1: (256, in_dim)   fc1 weight (PyTorch layout, out x in).
      b1: (256,)          fc1 bias.
      w2: (out_dim, 256)  sdf_linear weight (PyTorch layout).
      b2: (out_dim,)      sdf_linear bias.
      tm: requested batch-tile size (rows per grid step).  Capped so the grid
          keeps >= 4 steps for large batches and so the lane-padded working
          set fits the per-chip VMEM budget.
      compute_dtype: matmul input dtype.  f32 (default) keeps full precision
          on the SDF query coordinates; bf16 is available but buys no time at
          these feature sizes.  Accumulation is always f32.
      out_dtype: output dtype (defaults to x.dtype).  Set bf16 to halve the
          masked-store bytes on the (tm, out_dim) output path if needed.

    Returns:
      (B, out_dim) output.
    """
    x = jnp.asarray(x)
    B, in_dim = x.shape
    out_dim = w2.shape[0]
    out_dtype = x.dtype if out_dtype is None else jnp.dtype(out_dtype)

    cbytes = jnp.dtype(compute_dtype).itemsize
    obytes = jnp.dtype(out_dtype).itemsize

    # ---- layout-aware VMEM accounting -------------------------------------
    def _tile_bytes(rows: int, cols: int, nbytes: int) -> int:
        # VMEM stores tiles lane-padded to 128 and sublane-padded to
        # 8 (4-byte) / 16 (2-byte) rows.
        sub = 8 * (4 // nbytes)
        return _round_up(max(rows, 1), sub) * _round_up(max(cols, 1), 128) * nbytes

    def _vmem_est(t: int) -> int:
        est = 2 * _tile_bytes(t, in_dim, cbytes)        # x tile, double buffered
        est += 2 * _tile_bytes(t, out_dim, obytes)      # out tile, double buffered
        est += _tile_bytes(t, HIDDEN, 4)                # h accumulator (f32)
        if cbytes != 4:
            est += _tile_bytes(t, HIDDEN, cbytes)       # h cast for 2nd matmul
        est += 2 * _tile_bytes(in_dim, HIDDEN, cbytes)  # W1^T
        est += 2 * _tile_bytes(HIDDEN, out_dim, cbytes) # W2^T (lane-padded to 128)
        est += 2 * _tile_bytes(1, HIDDEN, 4)            # b1
        est += 2 * _tile_bytes(1, out_dim, 4)           # b2
        return est

    try:
        vmem_capacity = int(pltpu.get_tpu_info().vmem_capacity_bytes)
    except Exception:
        vmem_capacity = 64 << 20                        # v7x (smallest) fallback
    vmem_budget = max(16 << 20, vmem_capacity // 2)

    # ---- batch tile selection ----------------------------------------------
    # As large as possible (per-step overhead ~0.35 us dominates at these
    # tiny feature dims), but keep >= 4 grid steps for large batches so both
    # v7x TensorCores get work, and stay inside the per-chip VMEM budget.
    tm = max(8, _round_up(int(tm), 8))
    tm = min(tm, max(8, _round_up(-(-B // 4), 8)))
    while tm > 256 and _vmem_est(tm) > vmem_budget:
        tm = _round_up(tm // 2, 8)

    grid = (pl.cdiv(B, tm),)   # ragged last block: reads padded, writes masked

    # ---- operand prep ------------------------------------------------------
    # Pre-transpose weights to (in, out) so the kernel issues plain MXU
    # matmuls (lane dim = output features).  Biases stay f32.
    x_c = x.astype(compute_dtype)
    w1_t = jnp.asarray(w1).T.astype(compute_dtype)            # (in_dim, 256)
    w2_t = jnp.asarray(w2).T.astype(compute_dtype)            # (256, out_dim)
    b1_2d = jnp.asarray(b1).reshape(1, HIDDEN).astype(jnp.float32)
    b2_2d = jnp.asarray(b2).reshape(1, out_dim).astype(jnp.float32)

    # Advisory cost estimate so XLA can schedule/overlap neighbors sensibly.
    cost = pl.CostEstimate(
        flops=2 * B * (in_dim * HIDDEN + HIDDEN * out_dim),
        transcendentals=0,
        bytes_accessed=(B * in_dim * cbytes
                        + (in_dim * HIDDEN + HIDDEN * out_dim) * cbytes
                        + (HIDDEN + out_dim) * 4
                        + B * out_dim * obytes),
    )

    # Scoped-VMEM limit from the (lane-padded) estimate, capped at the
    # per-chip budget (capacity/2: 64 MiB on v5e/v6e, 32 MiB on v7x).
    vmem_limit = int(min(max(_vmem_est(tm) + (4 << 20), 16 << 20), vmem_budget))
    cparams = pltpu.CompilerParams(
        dimension_semantics=("parallel",),   # batch axis -> megacore on v7x
        vmem_limit_bytes=vmem_limit,
    )

    out = pl.pallas_call(
        _tiny_sdf_mlp_kernel,
        out_shape=jax.ShapeDtypeStruct((B, out_dim), out_dtype),
        grid_spec=pltpu.PrefetchScalarGridSpec(
            num_scalar_prefetch=0,
            grid=grid,
            in_specs=[
                # x tile: the only per-grid-step DMA (double-buffered).
                pl.BlockSpec((tm, in_dim), lambda i: (i, 0)),
                # Weights/biases: constant index_map keeps them pinned in VMEM
                # across grid steps (no per-step re-DMA); < 300 KiB total.
                pl.BlockSpec((in_dim, HIDDEN), lambda i: (0, 0)),   # W1^T
                pl.BlockSpec((1, HIDDEN), lambda i: (0, 0)),        # b1
                pl.BlockSpec((HIDDEN, out_dim), lambda i: (0, 0)),  # W2^T
                pl.BlockSpec((1, out_dim), lambda i: (0, 0)),       # b2
            ],
            # Natural (tm, out_dim) output layout.  out_dim < 128 means masked
            # stores; at these sizes the in-kernel repack to a 128-lane slab
            # or padding out_dim to 128 costs more than it saves (see header).
            out_specs=pl.BlockSpec((tm, out_dim), lambda i: (i, 0)),
        ),
        compiler_params=cparams,
        cost_estimate=cost,
    )(x_c, w1_t, b1_2d, w2_t, b2_2d)

    return out


# TODO(synk): normal()/dnormal_dw() in the PyTorch module use autograd on the
# forward pass; they are not part of forward() and are best obtained with
# jax.grad/jax.jacfwd over this wrapper rather than a hand-written kernel.


if __name__ == "__main__":
    key = jax.random.PRNGKey(0)
    in_dim, out_dim = 16, 8
    k = jax.random.split(key, 5)

    # Deterministic synthetic parameters (shapes match nn.Linear: (out, in)).
    w1 = jax.random.normal(k[1], (HIDDEN, in_dim), dtype=jnp.float32) * 0.05
    b1 = jax.random.normal(k[2], (HIDDEN,), dtype=jnp.float32) * 0.05
    w2 = jax.random.normal(k[3], (out_dim, HIDDEN), dtype=jnp.float32) * 0.05
    b2 = jax.random.normal(k[4], (out_dim,), dtype=jnp.float32) * 0.05

    def reference_f32(x):
        h = jnp.maximum(x @ w1.T + b1, 0.0)
        return h @ w2.T + b2

    def reference_bf16(x):
        # Same quantization points as the optional bf16 kernel path.
        xb = x.astype(jnp.bfloat16)
        h = jnp.dot(xb, w1.T.astype(jnp.bfloat16),
                    preferred_element_type=jnp.float32)
        h = jnp.maximum(h + b1, 0.0).astype(jnp.bfloat16)
        y = jnp.dot(h, w2.T.astype(jnp.bfloat16),
                    preferred_element_type=jnp.float32)
        return y + b2

    # 1) Small batch, default f32 path (single tile).
    x_small = jax.random.normal(k[0], (8, in_dim), dtype=jnp.float32)
    y_small = jax.block_until_ready(tiny_sdf_mlp(x_small, w1, b1, w2, b2))
    assert y_small.shape == (8, out_dim)
    assert jnp.allclose(y_small, reference_f32(x_small), atol=1e-4, rtol=1e-4), \
        "f32 path (small batch) mismatch vs reference"

    # 2) Larger batch, default f32, multi-step grid (grid>=4 cap -> 4x1024).
    x_big = jax.random.normal(k[0], (4096, in_dim), dtype=jnp.float32)
    y_big = jax.block_until_ready(tiny_sdf_mlp(x_big, w1, b1, w2, b2))
    assert y_big.shape == (4096, out_dim)
    assert jnp.allclose(y_big, reference_f32(x_big), atol=1e-4, rtol=1e-4), \
        "f32 path (large batch) mismatch vs reference"

    # 3) Ragged batch: grid = cdiv(1000, 256) = 4, last block masked in-kernel
    #    (no wrapper-side padding or slicing).
    x_rag = jax.random.normal(k[0], (1000, in_dim), dtype=jnp.float32)
    y_rag = jax.block_until_ready(tiny_sdf_mlp(x_rag, w1, b1, w2, b2))
    assert y_rag.shape == (1000, out_dim)
    assert jnp.allclose(y_rag, reference_f32(x_rag), atol=1e-4, rtol=1e-4), \
        "ragged-batch f32 path mismatch vs reference"

    # 4) Optional bf16 compute path (weights + activations bf16, f32 accum).
    y_bf16 = jax.block_until_ready(
        tiny_sdf_mlp(x_rag, w1, b1, w2, b2, compute_dtype=jnp.bfloat16))
    assert y_bf16.shape == (1000, out_dim)
    assert jnp.allclose(y_bf16, reference_bf16(x_rag), atol=1e-3, rtol=1e-3), \
        "bf16 path mismatch vs bf16-quantized reference"

    print("KERNEL_OK")
</pallas_src>

<mosaic_0001>
module attributes {stable_mosaic.version = 11 : i64} {
  func.func @_tiny_sdf_mlp_kernel(%arg0: i32, %arg1: memref<8x16xf32, #tpu.memory_space<vmem>>, %arg2: memref<16x256xf32, #tpu.memory_space<vmem>>, %arg3: memref<1x256xf32, #tpu.memory_space<vmem>>, %arg4: memref<256x8xf32, #tpu.memory_space<vmem>>, %arg5: memref<1x8xf32, #tpu.memory_space<vmem>>, %arg6: memref<8x8xf32, #tpu.memory_space<vmem>>) attributes {dimension_semantics = [#tpu.dimension_semantics<parallel>], iteration_bounds = array<i64: 1>, scalar_prefetch = 0 : i64, scratch_operands = 0 : i64, tpu.core_type = #tpu.core_type<tc>, window_params = [{transform_indices = @transform_0, window_bounds = array<i64: 8, 16>}, {pipeline_mode = #tpu.pipeline_mode<synchronous>, transform_indices = @transform_1, window_bounds = array<i64: 16, 256>}, {pipeline_mode = #tpu.pipeline_mode<synchronous>, transform_indices = @transform_2, window_bounds = array<i64: 1, 256>}, {pipeline_mode = #tpu.pipeline_mode<synchronous>, transform_indices = @transform_3, window_bounds = array<i64: 256, 8>}, {pipeline_mode = #tpu.pipeline_mode<synchronous>, transform_indices = @transform_4, window_bounds = array<i64: 1, 8>}, {transform_indices = @transform_5, window_bounds = array<i64: 8, 8>}]} {
    %c0 = arith.constant 0 : index
    %c0_0 = arith.constant 0 : index
    %0 = vector.load %arg1[%c0, %c0_0] : memref<8x16xf32, #tpu.memory_space<vmem>>, vector<8x16xf32>
    %c0_1 = arith.constant 0 : index
    %c0_2 = arith.constant 0 : index
    %1 = vector.load %arg2[%c0_1, %c0_2] : memref<16x256xf32, #tpu.memory_space<vmem>>, vector<16x256xf32>
    %cst = arith.constant dense<0.000000e+00> : vector<8x256xf32>
    %2 = tpu.matmul %0, %1, %cst {dimension_numbers = #tpu.dot_dimension_numbers<[1], [0], [0], [1], [0, 0, 1, 1], [], []>} : vector<8x16xf32>, vector<16x256xf32>, vector<8x256xf32> -> vector<8x256xf32>
    %c0_3 = arith.constant 0 : index
    %c0_4 = arith.constant 0 : index
    %3 = vector.load %arg3[%c0_3, %c0_4] : memref<1x256xf32, #tpu.memory_space<vmem>>, vector<1x256xf32>
    %4 = vector.broadcast %3 : vector<1x256xf32> to vector<8x256xf32>
    %5 = arith.addf %2, %4 : vector<8x256xf32>
    %cst_5 = arith.constant 0.000000e+00 : f32
    %6 = vector.broadcast %cst_5 : f32 to vector<8x256xf32>
    %7 = arith.maximumf %5, %6 : vector<8x256xf32>
    %c0_6 = arith.constant 0 : index
    %c0_7 = arith.constant 0 : index
    %8 = vector.load %arg4[%c0_6, %c0_7] : memref<256x8xf32, #tpu.memory_space<vmem>>, vector<256x8xf32>
    %cst_8 = arith.constant dense<0.000000e+00> : vector<8x8xf32>
    %9 = tpu.matmul %7, %8, %cst_8 {dimension_numbers = #tpu.dot_dimension_numbers<[1], [0], [0], [1], [0, 0, 1, 1], [], []>} : vector<8x256xf32>, vector<256x8xf32>, vector<8x8xf32> -> vector<8x8xf32>
    %c0_9 = arith.constant 0 : index
    %c0_10 = arith.constant 0 : index
    %10 = vector.load %arg5[%c0_9, %c0_10] : memref<1x8xf32, #tpu.memory_space<vmem>>, vector<1x8xf32>
    %11 = vector.broadcast %10 : vector<1x8xf32> to vector<8x8xf32>
    %12 = arith.addf %9, %11 : vector<8x8xf32>
    %c0_11 = arith.constant 0 : index
    %c0_12 = arith.constant 0 : index
    %13 = vector.load %arg6[%c0_11, %c0_12] : memref<8x8xf32, #tpu.memory_space<vmem>>, vector<8x8xf32>
    tpu.vector_store %arg6[%c0_11, %c0_12], %12 {strides = array<i32>} : memref<8x8xf32, #tpu.memory_space<vmem>>, vector<8x8xf32>,
    return
  }
  func.func @transform_0(%arg0: i32) -> (i32, i32) {
    %c0_i32 = arith.constant 0 : i32
    %c0_i32_0 = arith.constant 0 : i32
    return %arg0, %c0_i32 : i32, i32
  }
  func.func @transform_1(%arg0: i32) -> (i32, i32) {
    %c0_i32 = arith.constant 0 : i32
    %c0_i32_0 = arith.constant 0 : i32
    %c0_i32_1 = arith.constant 0 : i32
    return %c0_i32, %c0_i32_0 : i32, i32
  }
  func.func @transform_2(%arg0: i32) -> (i32, i32) {
    %c0_i32 = arith.constant 0 : i32
    %c0_i32_0 = arith.constant 0 : i32
    %c0_i32_1 = arith.constant 0 : i32
    return %c0_i32, %c0_i32_0 : i32, i32
  }
  func.func @transform_3(%arg0: i32) -> (i32, i32) {
    %c0_i32 = arith.constant 0 : i32
    %c0_i32_0 = arith.constant 0 : i32
    %c0_i32_1 = arith.constant 0 : i32
    return %c0_i32, %c0_i32_0 : i32, i32
  }
  func.func @transform_4(%arg0: i32) -> (i32, i32) {
    %c0_i32 = arith.constant 0 : i32
    %c0_i32_0 = arith.constant 0 : i32
    %c0_i32_1 = arith.constant 0 : i32
    return %c0_i32, %c0_i32_0 : i32, i32
  }
  func.func @transform_5(%arg0: i32) -> (i32, i32) {
    %c0_i32 = arith.constant 0 : i32
    %c0_i32_0 = arith.constant 0 : i32
    return %arg0, %c0_i32 : i32, i32
  }
}

</mosaic_0001>

<bundles_post_ra>
// kernel: tpu_custom_call.1
= control target key start
LH: loop header
LB: loop body
LE: loop exit
PB: predicated region body
PF: predicated region fallthrough
CT: control target
= control target key end

     0   :  { %v339_v5 = vmov 0.0   ;;  %vm38_vm0 = vcmask 130048   ;;  %s500_s0 = inlined_call_operand.vmem [shape: f32[8,16], index: 0, kind: input, shape index: {}]   ;;  %s501_s1 = inlined_call_operand.vmem [shape: f32[16,256], index: 1, kind: input, shape index: {}]   ;;  %s502_s2 = inlined_call_operand.vmem [shape: f32[1,256], index: 2, kind: input, shape index: {}]   ;;  %s503_s3 = inlined_call_operand.vmem [shape: f32[256,8], index: 3, kind: input, shape index: {}]   ;;  %s504_s4 = inlined_call_operand.vmem [shape: f32[1,8], index: 4, kind: input, shape index: {}]   ;;  %s505_s5 = inlined_call_operand.hbm [shape: f32[8,8], index: 5, kind: output, shape index: {}]  }
   0x1   :  { %v23_v0 = vld [vmem:[%s501_s1 + $0x8] sm:$0xff]  ;;  %v25_v1 = vld [vmem:[%s501_s1 + $0x18] sm:$0xff]  ;;  %v22_v2 = vld [vmem:[%s501_s1] sm:$0xff]  ;;  %106 = vmatprep.mubr.f32.mxu0 %v339_v5 }
   0x2   :  { %v277_v3 = vpack.c.bf16 %v25_v1, %v23_v0  ;;  %v24_v4 = vld [vmem:[%s501_s1 + $0x10] sm:$0xff]  ;;  %v131_v6 = vld [vmem:[%s503_s3 + $0x80] sm:$0xff]  ;;  %v132_v9 = vld [vmem:[%s503_s3 + $0x88] sm:$0xff] }
   0x3   :  { %v279_v7 = vpack.c.bf16 %v24_v4, %v22_v2  ;;  %v21_v8 = vld [vmem:[%s500_s0] sm:$0xff]  ;;  %v116_v11 = vld [vmem:[%s503_s3 + $0x8] sm:$0xff]  ;;  %v281_v12 = vpack.c.bf16 %v132_v9, %v131_v6  ;;  %v133_v14 = vld [vmem:[%s503_s3 + $0x90] sm:$0xff] }
   0x4   :  { %v115_v10 = vld [vmem:[%s503_s3] sm:$0xff]  ;;  %278 = vmatprep.subr.bf16.mxu0 %v277_v3  ;;  %v134_v15 = vld [vmem:[%s503_s3 + $0x98] sm:$0xff]  ;;  %v117_v16 = vld [vmem:[%s503_s3 + $0x10] sm:$0xff] }
   0x5   :  { %v283_v13 = vpack.c.bf16 %v116_v11, %v115_v10  ;;  %280 = vmatpush1.bf16.msra.mxu0 %v279_v7  ;;  %v285_v17 = vpack.c.bf16 %v134_v15, %v133_v14  ;;  %v118_v18 = vld [vmem:[%s503_s3 + $0x18] sm:$0xff]  ;;  %v135_v19 = vld [vmem:[%s503_s3 + $0xa0] sm:$0xff]  ;;  %v136_v20 = vld [vmem:[%s503_s3 + $0xa8] sm:$0xff]  ;;  %282 = vmatprep.subr.bf16.mxu1 %v281_v12 }
   0x6   :  { %v287_v21 = vpack.c.bf16 %v118_v18, %v117_v16  ;;  %v289_v22 = vpack.c.bf16 %v136_v20, %v135_v19  ;;  %v119_v23 = vld [vmem:[%s503_s3 + $0x20] sm:$0xff]  ;;  %v120_v24 = vld [vmem:[%s503_s3 + $0x28] sm:$0xff]  ;;  %v137_v25 = vld [vmem:[%s503_s3 + $0xb0] sm:$0xff] }
   0x7   :  { %284 = vmatpush3.bf16.msra.mxu1 %v283_v13  ;;  %v138_v26 = vld [vmem:[%s503_s3 + $0xb8] sm:$0xff]  ;;  %v291_v27 = vpack.c.bf16 %v120_v24, %v119_v23 }
   0x8   :  { %240 = vmatmul.mubr.msk.f32.vlgmr.msra.gmra.mrb[0].mxu0 %vm38_vm0, %v21_v8  ;;  %286 = vmatprep.subr.bf16.mxu1 %v285_v17 }
   0xb   :  { %288 = vmatpush3.bf16.msra.mxu1 %v287_v21 }
   0xc   :  { %10 = vsyncpa [#allocation3], 0  ;;  %290 = vmatprep.subr.bf16.mxu1 %v289_v22  ;;  %v293_v28 = vpack.c.bf16 %v138_v26, %v137_v25  ;;  %v121_v29 = vld [vmem:[%s503_s3 + $0x30] sm:$0xff]  ;;  %v122_v30 = vld [vmem:[%s503_s3 + $0x38] sm:$0xff]  ;;  %v28_v56 = vlaneseq  ;;  %s340_s14 = smov [#allocation2]   ;;  %vm224_vm1 = vcmask 64512  }
   0xd   :  { %v139_v31 = vld [vmem:[%s503_s3 + $0xc0] sm:$0xff]  ;;  %v140_v32 = vld [vmem:[%s503_s3 + $0xc8] sm:$0xff]  ;;  %v295_v33 = vpack.c.bf16 %v122_v30, %v121_v29  ;;  %v141_v37 = vld [vmem:[%s503_s3 + $0xd0] sm:$0xff]  ;;  %s232_s15 = sshll.u32 %s340_s14, 4  ;;  %s233_s15 = int_to_ptr.vmem [resolvable:$true] %s232_s15 }
   0xe   :  { %v297_v34 = vpack.c.bf16 %v140_v32, %v139_v31  ;;  %v123_v35 = vld [vmem:[%s503_s3 + $0x40] sm:$0xff]  ;;  %v124_v36 = vld [vmem:[%s503_s3 + $0x48] sm:$0xff]  ;;  %v142_v38 = vld [vmem:[%s503_s3 + $0xd8] sm:$0xff]  ;;  %v29_v57 = vshrl.u32 %v28_v56, 7  ;;  %p320_p1 = scmp.lt.s32.totalorder %s233_s15, %s233_s15 }
   0xf   :  { %292 = vmatpush3.bf16.msra.mxu1 %v291_v27  ;;  %v299_v39 = vpack.c.bf16 %v124_v36, %v123_v35  ;;  %v301_v40 = vpack.c.bf16 %v142_v38, %v141_v37  ;;  %v125_v41 = vld [vmem:[%s503_s3 + $0x50] sm:$0xff]  ;;  %v126_v42 = vld [vmem:[%s503_s3 + $0x58] sm:$0xff]  ;;  %v143_v43 = vld [vmem:[%s503_s3 + $0xe0] sm:$0xff] }
  0x10   :  { %294 = vmatprep.subr.bf16.mxu1 %v293_v28  ;;  %v144_v44 = vld [vmem:[%s503_s3 + $0xe8] sm:$0xff]  ;;  %v303_v45 = vpack.c.bf16 %v126_v42, %v125_v41  ;;  %v127_v47 = vld [vmem:[%s503_s3 + $0x60] sm:$0xff]  ;;  %v145_v50 = vld [vmem:[%s503_s3 + $0xf0] sm:$0xff]  ;;  %v30_v58 = vsub.s32 0, %v29_v57  ;;  %v34_v60 = vsub.s32 1, %v29_v57 }
  0x11   :  { %v305_v46 = vpack.c.bf16 %v144_v44, %v143_v43  ;;  %v128_v48 = vld [vmem:[%s503_s3 + $0x68] sm:$0xff]  ;;  %v146_v51 = vld [vmem:[%s503_s3 + $0xf8] sm:$0xff]  ;;  %v129_v53 = vld [vmem:[%s503_s3 + $0x70] sm:$0xff] }
  0x12   :  { %v307_v49 = vpack.c.bf16 %v128_v48, %v127_v47  ;;  %v309_v52 = vpack.c.bf16 %v146_v51, %v145_v50  ;;  %v130_v54 = vld [vmem:[%s503_s3 + $0x78] sm:$0xff]  ;;  %v26_v59 = vld [vmem:[%s502_s2] sm:$0x3]  ;;  %s315_s2 = scalar_lea.vmem %s233_s15, 128 }
  0x13   :  { %296 = vmatpush3.bf16.msra.mxu1 %v295_v33  ;;  %v311_v55 = vpack.c.bf16 %v130_v54, %v129_v53  ;;  %v31_v61 = vrot.slane %v26_v59, %v30_v58  ;;  %v35_v62 = vrot.slane %v26_v59, %v34_v60  ;;  %v241_v6 = vld [vmem:[%s504_s4] ss:$0 sm:$0xff]  ;;  %p316_p0 = scmp.ne.s32.totalorder %s233_s15, %s315_s2  ;;  %p321_p2 = scmp.lt.s32.totalorder %s315_s2, %s315_s2 }
  0x14   :  { %298 = vmatprep.subr.bf16.mxu1 %v297_v34 }
  0x15   :  { %p322_p3 = por %p321_p2, %p320_p1 }
  0x17   :  { %300 = vmatpush3.bf16.msra.mxu1 %v299_v39  ;;  %p323_p4 = pnand %p322_p3, %p316_p0 }
  0x18   :  { %302 = vmatprep.subr.bf16.mxu1 %v301_v40 }
  0x1b   :  { %304 = vmatpush3.bf16.msra.mxu1 %v303_v45 }
  0x1c   :  { %306 = vmatprep.subr.bf16.mxu1 %v305_v46 }
  0x1f   :  { %308 = vmatpush3.bf16.msra.mxu1 %v307_v49 }
  0x20   :  { %310 = vmatprep.subr.bf16.mxu1 %v309_v52 }
  0x23   :  { %312 = vmatpush3.bf16.msra.mxu1 %v311_v55 }
  0xdb   :  { %v108_v63 = vpop.f32.mrb[0].mxu0 }
  0xdc   :  { %v109_v0 = vadd.f32 %v108_v63, %v31_v61  ;;  %v110_v1 = vpop.f32.mrb[1].mxu0 }
  0xdd   :  { %v111_v2 = vadd.f32 %v110_v1, %v35_v62 }
  0xde   :  { %v113_v4 = vmax.f32 %v109_v0, 0.0 }
  0xdf   :  { %v114_v3 = vmax.f32 %v111_v2, 0.0 }
  0xe1   :  { %218 = vmatprep.mubr.f32.mxu1 %v114_v3 }
  0xe2   :  { %219 = vmatmul.mubr.f32.vlgmr.msra.gmra.mrb[0].mxu1 %v113_v4 }
 0x1b5   :  { %v274_v5 = vpop.f32.mrb[0].mxu1 }
 0x1b6   :  { %v275_v7 = vpop.f32.mrb[1].mxu1 }
 0x1b7   :  { %v276_v8 = vadd.f32 %v275_v7, %v274_v5 }
 0x1b9   :  { %v221_v9 = vadd.f32 %v276_v8, %v241_v6 }
 0x1bb   :  { %225 = vst.msk [vmem:[#allocation2] sm:$0xff] %vm224_vm1, %v221_v9 }
 0x1bc   :  { %326 = shalt.err (!%p323_p4)
}
 0x1bd   :  { %s327_s18 = scalar_lea.hbm %s505_s5, 128 }
 0x1be   :  { %p328_p5 = scmp.ne.s32.totalorder %s505_s5, %s327_s18  ;;  %p331_p6 = scmp.lt.u32.totalorder %s327_s18, %s505_s5 }
 0x1c0   :  { %p333_p7 = pnand %p331_p6, %p328_p5 }
 0x1c2   :  { %336 = shalt.err (!%p333_p7)
}
 0x1c3   :  { %235 = dma.vmem_to_hbm [thread:$0]  %s233_s15, 128, %s505_s5, [#allocation3]  }
 0x1c4   :  { %337 = dma.done.wait [#allocation3], 128  }
 0x1c5   :  { %338 = vsyncadd [#allocation3], 4294967168 }
 0x1c6   :  { %239 = vsyncpa [#allocation3], 1 }

</bundles_post_ra>
